<compile_context>
chip_gen: v6e
topology: v6e:2x2x1
jax: 0.10.0
libtpu: 0.0.40
codegen_flags: <defaults>
</compile_context>

<pallas_src>
import jax
import jax.numpy as jnp
from jax import lax
from jax.experimental import pallas as pl
from jax.experimental.pallas import tpu as pltpu


def _make_kernel(bb: int, n_wq: int, way: int, patch_num: int, sp: int,
                 neighbor_k: int):
    """Build the per-grid-step kernel (all extents are static Python ints)."""
    rows = n_wq * patch_num
    inv = 1.0 / float(patch_num * neighbor_k)   # Python float -> no captured const
    neg_inf = float("-inf")

    def kernel(q_ref, s_ref, o_ref):
        # q_ref: (bb, n_wq*patch_num, dim)   bf16 (or f32 validation path)
        # s_ref: (bb, way*sp, dim)           sp = shot * patch_num
        # o_ref: (bb, n_wq, way)             f32
        #
        # Hoisted loop invariants (built once per grid step; JAX does not CSE
        # broadcast_in_dim).  `pool` turns the per-patch top-k sums into the
        # (n_wq, way) patch/neighbor mean via one tiny MXU matmul.
        r_iota = lax.broadcasted_iota(jnp.int32, (n_wq, rows), 1)
        q_iota = lax.broadcasted_iota(jnp.int32, (n_wq, rows), 0)
        start = q_iota * patch_num
        owned = (r_iota >= start) & (r_iota < start + patch_num)
        pool = jnp.where(owned, inv, 0.0).astype(jnp.float32)   # (n_wq, rows)

        @pl.loop(0, bb)
        def _(b):
            q = q_ref[b]                       # (rows, dim)
            s = s_ref[b]                       # (way*sp, dim)
            # Transposed score slab: (way*sp, rows).  Per-way slices below are
            # aligned sublane slices (free vreg subsets), and the matmul is one
            # fused MXU op with f32 accumulation.
            scores_t = lax.dot_general(
                s, q, (((1,), (1,)), ((), ())),
                preferred_element_type=jnp.float32)

            per_way = []
            for j in range(way):
                vals = scores_t[j * sp:(j + 1) * sp, :]        # (sp, rows)
                topk_sum = None
                for r in range(neighbor_k):
                    m = jnp.max(vals, axis=0, keepdims=True)   # (1, rows)
                    topk_sum = m if topk_sum is None else topk_sum + m
                    if r + 1 < neighbor_k:
                        # Mask the current maxima.  NOTE: under exact FP ties
                        # this drops all tied copies at once, whereas
                        # torch.topk keeps duplicates; identical for
                        # non-degenerate inputs.
                        vals = jnp.where(vals == m, neg_inf, vals)
                per_way.append(topk_sum)                       # (1, rows)

            topk_cat = jnp.concatenate(per_way, axis=0)        # (way, rows)
            # sims[i, j] = inv * sum_{p in patches of query i} topk_cat[j, p]
            sims = lax.dot_general(
                pool, topk_cat, (((1,), (1,)), ((), ())),
                preferred_element_type=jnp.float32)            # (n_wq, way)
            o_ref[b] = sims                                    # direct per-b store

    return kernel


def local_patch_classifier_v2(query_fea, support_fea, neighbor_k: int = 3,
                              batch_block: int | None = None,
                              compute_dtype=jnp.bfloat16):
    """Pallas implementation of localPatchClassifierV2.forward."""
    batch, way, shot, patch_num, dim = support_fea.shape
    qb, n_wq, q_patch, q_dim = query_fea.shape
    assert qb == batch and q_patch == patch_num and q_dim == dim

    sp = shot * patch_num
    assert neighbor_k <= sp, "neighbor_k must not exceed shot*patch_num"
    rows = n_wq * patch_num

    # Lane/MXU-friendly 3D layouts built in the wrapper (no in-kernel reshape).
    # bf16 inputs halve DMA bytes; f32 accumulation stays inside the kernel.
    query = query_fea.reshape(batch, rows, dim).astype(compute_dtype)
    support = support_fea.reshape(batch, way * sp, dim).astype(compute_dtype)

    in_bytes = jnp.dtype(compute_dtype).itemsize
    if batch_block is None:
        # Double-buffered per-step footprint: 2x both input tiles + 2x output.
        per_b_bytes = (2 * (rows * dim + way * sp * dim) * in_bytes
                       + 2 * n_wq * way * 4)
        budget = 8 * 1024 * 1024          # fits v5e's 16 MiB scoped VMEM default
        bb = max(1, min(batch, budget // max(per_b_bytes, 1)))
        bb = min(bb, 8)                   # bound the in-kernel batch loop
        if batch >= 2:
            # Keep >= 2 grid steps so "parallel" semantics shard across v7x's
            # two TensorCores.
            bb = min(bb, pl.cdiv(batch, 2))
    else:
        bb = max(1, min(batch_block, batch))

    num_steps = pl.cdiv(batch, bb)
    padded = num_steps * bb
    if padded != batch:
        # Pad the batch instead of shrinking bb for awkward batch sizes.
        qpad = jnp.zeros((padded - batch, rows, dim), query.dtype)
        spad = jnp.zeros((padded - batch, way * sp, dim), support.dtype)
        query = jnp.concatenate([query, qpad], axis=0)
        support = jnp.concatenate([support, spad], axis=0)

    kernel = _make_kernel(bb, n_wq, way, patch_num, sp, neighbor_k)

    out = pl.pallas_call(
        kernel,
        out_shape=jax.ShapeDtypeStruct((padded, n_wq, way), jnp.float32),
        grid=(num_steps,),
        in_specs=[
            pl.BlockSpec((bb, rows, dim), lambda g: (g, 0, 0)),
            pl.BlockSpec((bb, way * sp, dim), lambda g: (g, 0, 0)),
        ],
        out_specs=pl.BlockSpec((bb, n_wq, way), lambda g: (g, 0, 0)),
        compiler_params=pltpu.CompilerParams(
            dimension_semantics=("parallel",)),   # shards steps across TCs on v7x
    )(query, support)
    return out[:batch]


def _reference(query_fea, support_fea, neighbor_k: int = 3):
    """Pure-JAX reference matching the PyTorch forward."""
    batch, way, shot, patch_num, dim = support_fea.shape
    s = support_fea.reshape(batch, way, shot * patch_num, dim).astype(jnp.float32)
    q = query_fea.astype(jnp.float32)
    # (batch, n_wq, way, patch_num, shot*patch_num)
    inner = jnp.einsum("biqd,bjsd->bijqs", q, s)
    topk_vals, _ = lax.top_k(inner, neighbor_k)
    return jnp.mean(topk_vals.reshape(*topk_vals.shape[:3], -1), axis=-1)


if __name__ == "__main__":
    # Small, module-consistent shapes.
    batch, way, shot, patch_num, dim = 2, 4, 2, 16, 64
    n_wq = 8
    neighbor_k = 3

    key = jax.random.PRNGKey(0)
    kq, ks = jax.random.split(key)
    query_fea = jax.random.normal(kq, (batch, n_wq, patch_num, dim),
                                  dtype=jnp.float32)
    support_fea = jax.random.normal(ks, (batch, way, shot, patch_num, dim),
                                    dtype=jnp.float32)

    # Fast path: bf16 inputs, f32 accumulation.
    out = jax.block_until_ready(
        local_patch_classifier_v2(query_fea, support_fea, neighbor_k))
    assert out.shape == (batch, n_wq, way)

    # Validate the bf16 fast path against a reference fed the same
    # bf16-rounded inputs (isolates kernel logic from input-precision loss).
    q_bf = query_fea.astype(jnp.bfloat16).astype(jnp.float32)
    s_bf = support_fea.astype(jnp.bfloat16).astype(jnp.float32)
    ref_bf = _reference(q_bf, s_bf, neighbor_k)
    assert jnp.allclose(out, ref_bf, atol=2e-2, rtol=2e-2), "bf16 path mismatch"

    # Full-precision path: exact module semantics vs f32 reference.
    out_f32 = jax.block_until_ready(
        local_patch_classifier_v2(query_fea, support_fea, neighbor_k,
                                  compute_dtype=jnp.float32))
    ref = _reference(query_fea, support_fea, neighbor_k)
    assert jnp.allclose(out_f32, ref, atol=1e-4, rtol=1e-4), "f32 path mismatch"

    print("KERNEL_OK")
</pallas_src>

<mosaic_0001>
module attributes {stable_mosaic.version = 11 : i64} {
  func.func @kernel(%arg0: i32, %arg1: memref<1x128x64xbf16, #tpu.memory_space<vmem>>, %arg2: memref<1x128x64xbf16, #tpu.memory_space<vmem>>, %arg3: memref<1x8x4xf32, #tpu.memory_space<vmem>>) attributes {dimension_semantics = [#tpu.dimension_semantics<parallel>], iteration_bounds = array<i64: 2>, scalar_prefetch = 0 : i64, scratch_operands = 0 : i64, tpu.core_type = #tpu.core_type<tc>, window_params = [{transform_indices = @transform_0, window_bounds = array<i64: 1, 128, 64>}, {transform_indices = @transform_1, window_bounds = array<i64: 1, 128, 64>}, {transform_indices = @transform_2, window_bounds = array<i64: 1, 8, 4>}]} {
    %0 = tpu.iota {dimensions = array<i32: 1>} : vector<8x128xi32>
    %1 = tpu.iota {dimensions = array<i32: 0>} : vector<8x128xi32>
    %c16_i32 = arith.constant 16 : i32
    %2 = vector.broadcast %c16_i32 : i32 to vector<8x128xi32>
    %3 = arith.muli %1, %2 : vector<8x128xi32>
    %4 = arith.cmpi sge, %0, %3 : vector<8x128xi32>
    %c16_i32_0 = arith.constant 16 : i32
    %5 = vector.broadcast %c16_i32_0 : i32 to vector<8x128xi32>
    %6 = arith.addi %3, %5 : vector<8x128xi32>
    %7 = arith.cmpi slt, %0, %6 : vector<8x128xi32>
    %8 = arith.andi %4, %7 : vector<8x128xi1>
    %cst = arith.constant 0.020833334 : f32
    %cst_1 = arith.constant 0.000000e+00 : f32
    %9 = vector.broadcast %cst : f32 to vector<8x128xf32>
    %10 = vector.broadcast %cst_1 : f32 to vector<8x128xf32>
    %11 = arith.select %8, %9, %10 : vector<8x128xi1>, vector<8x128xf32>
    %c0_i32 = arith.constant 0 : i32
    %c1_i32 = arith.constant 1 : i32
    %12 = arith.muli %c0_i32, %c1_i32 : i32
    %c0_i32_2 = arith.constant 0 : i32
    %13 = arith.addi %c0_i32_2, %12 : i32
    %14 = arith.index_cast %13 : i32 to index
    %c0 = arith.constant 0 : index
    %c0_3 = arith.constant 0 : index
    %15 = vector.load %arg1[%14, %c0, %c0_3] : memref<1x128x64xbf16, #tpu.memory_space<vmem>>, vector<1x128x64xbf16>
    %16 = vector.shape_cast %15 : vector<1x128x64xbf16> to vector<128x64xbf16>
    %17 = arith.index_cast %13 : i32 to index
    %c0_4 = arith.constant 0 : index
    %c0_5 = arith.constant 0 : index
    %18 = vector.load %arg2[%17, %c0_4, %c0_5] : memref<1x128x64xbf16, #tpu.memory_space<vmem>>, vector<1x128x64xbf16>
    %19 = vector.shape_cast %18 : vector<1x128x64xbf16> to vector<128x64xbf16>
    %cst_6 = arith.constant dense<0.000000e+00> : vector<128x128xf32>
    %20 = tpu.matmul %19, %16, %cst_6 {dimension_numbers = #tpu.dot_dimension_numbers<[1], [1], [0], [0], [0, 0, 1, 0], [], []>} : vector<128x64xbf16>, vector<128x64xbf16>, vector<128x128xf32> -> vector<128x128xf32>
    %21 = vector.extract_strided_slice %20 {offsets = [0, 0], sizes = [32, 128], strides = [1, 1]} : vector<128x128xf32> to vector<32x128xf32>
    %cst_7 = arith.constant dense<0xFF800000> : vector<128xf32>
    %22 = vector.multi_reduction <maximumf>, %21, %cst_7 [0] : vector<32x128xf32> to vector<128xf32>
    %23 = vector.shape_cast %22 : vector<128xf32> to vector<1x128xf32>
    %24 = vector.broadcast %23 : vector<1x128xf32> to vector<32x128xf32>
    %25 = arith.cmpf oeq, %21, %24 : vector<32x128xf32>
    %cst_8 = arith.constant 0xFF800000 : f32
    %26 = vector.broadcast %cst_8 : f32 to vector<32x128xf32>
    %27 = arith.select %25, %26, %21 : vector<32x128xi1>, vector<32x128xf32>
    %cst_9 = arith.constant dense<0xFF800000> : vector<128xf32>
    %28 = vector.multi_reduction <maximumf>, %27, %cst_9 [0] : vector<32x128xf32> to vector<128xf32>
    %29 = vector.shape_cast %28 : vector<128xf32> to vector<1x128xf32>
    %30 = arith.addf %23, %29 : vector<1x128xf32>
    %31 = vector.broadcast %29 : vector<1x128xf32> to vector<32x128xf32>
    %32 = arith.cmpf oeq, %27, %31 : vector<32x128xf32>
    %cst_10 = arith.constant 0xFF800000 : f32
    %33 = vector.broadcast %cst_10 : f32 to vector<32x128xf32>
    %34 = arith.select %32, %33, %27 : vector<32x128xi1>, vector<32x128xf32>
    %cst_11 = arith.constant dense<0xFF800000> : vector<128xf32>
    %35 = vector.multi_reduction <maximumf>, %34, %cst_11 [0] : vector<32x128xf32> to vector<128xf32>
    %36 = vector.shape_cast %35 : vector<128xf32> to vector<1x128xf32>
    %37 = arith.addf %30, %36 : vector<1x128xf32>
    %38 = vector.extract_strided_slice %20 {offsets = [32, 0], sizes = [32, 128], strides = [1, 1]} : vector<128x128xf32> to vector<32x128xf32>
    %cst_12 = arith.constant dense<0xFF800000> : vector<128xf32>
    %39 = vector.multi_reduction <maximumf>, %38, %cst_12 [0] : vector<32x128xf32> to vector<128xf32>
    %40 = vector.shape_cast %39 : vector<128xf32> to vector<1x128xf32>
    %41 = vector.broadcast %40 : vector<1x128xf32> to vector<32x128xf32>
    %42 = arith.cmpf oeq, %38, %41 : vector<32x128xf32>
    %cst_13 = arith.constant 0xFF800000 : f32
    %43 = vector.broadcast %cst_13 : f32 to vector<32x128xf32>
    %44 = arith.select %42, %43, %38 : vector<32x128xi1>, vector<32x128xf32>
    %cst_14 = arith.constant dense<0xFF800000> : vector<128xf32>
    %45 = vector.multi_reduction <maximumf>, %44, %cst_14 [0] : vector<32x128xf32> to vector<128xf32>
    %46 = vector.shape_cast %45 : vector<128xf32> to vector<1x128xf32>
    %47 = arith.addf %40, %46 : vector<1x128xf32>
    %48 = vector.broadcast %46 : vector<1x128xf32> to vector<32x128xf32>
    %49 = arith.cmpf oeq, %44, %48 : vector<32x128xf32>
    %cst_15 = arith.constant 0xFF800000 : f32
    %50 = vector.broadcast %cst_15 : f32 to vector<32x128xf32>
    %51 = arith.select %49, %50, %44 : vector<32x128xi1>, vector<32x128xf32>
    %cst_16 = arith.constant dense<0xFF800000> : vector<128xf32>
    %52 = vector.multi_reduction <maximumf>, %51, %cst_16 [0] : vector<32x128xf32> to vector<128xf32>
    %53 = vector.shape_cast %52 : vector<128xf32> to vector<1x128xf32>
    %54 = arith.addf %47, %53 : vector<1x128xf32>
    %55 = vector.extract_strided_slice %20 {offsets = [64, 0], sizes = [32, 128], strides = [1, 1]} : vector<128x128xf32> to vector<32x128xf32>
    %cst_17 = arith.constant dense<0xFF800000> : vector<128xf32>
    %56 = vector.multi_reduction <maximumf>, %55, %cst_17 [0] : vector<32x128xf32> to vector<128xf32>
    %57 = vector.shape_cast %56 : vector<128xf32> to vector<1x128xf32>
    %58 = vector.broadcast %57 : vector<1x128xf32> to vector<32x128xf32>
    %59 = arith.cmpf oeq, %55, %58 : vector<32x128xf32>
    %cst_18 = arith.constant 0xFF800000 : f32
    %60 = vector.broadcast %cst_18 : f32 to vector<32x128xf32>
    %61 = arith.select %59, %60, %55 : vector<32x128xi1>, vector<32x128xf32>
    %cst_19 = arith.constant dense<0xFF800000> : vector<128xf32>
    %62 = vector.multi_reduction <maximumf>, %61, %cst_19 [0] : vector<32x128xf32> to vector<128xf32>
    %63 = vector.shape_cast %62 : vector<128xf32> to vector<1x128xf32>
    %64 = arith.addf %57, %63 : vector<1x128xf32>
    %65 = vector.broadcast %63 : vector<1x128xf32> to vector<32x128xf32>
    %66 = arith.cmpf oeq, %61, %65 : vector<32x128xf32>
    %cst_20 = arith.constant 0xFF800000 : f32
    %67 = vector.broadcast %cst_20 : f32 to vector<32x128xf32>
    %68 = arith.select %66, %67, %61 : vector<32x128xi1>, vector<32x128xf32>
    %cst_21 = arith.constant dense<0xFF800000> : vector<128xf32>
    %69 = vector.multi_reduction <maximumf>, %68, %cst_21 [0] : vector<32x128xf32> to vector<128xf32>
    %70 = vector.shape_cast %69 : vector<128xf32> to vector<1x128xf32>
    %71 = arith.addf %64, %70 : vector<1x128xf32>
    %72 = vector.extract_strided_slice %20 {offsets = [96, 0], sizes = [32, 128], strides = [1, 1]} : vector<128x128xf32> to vector<32x128xf32>
    %cst_22 = arith.constant dense<0xFF800000> : vector<128xf32>
    %73 = vector.multi_reduction <maximumf>, %72, %cst_22 [0] : vector<32x128xf32> to vector<128xf32>
    %74 = vector.shape_cast %73 : vector<128xf32> to vector<1x128xf32>
    %75 = vector.broadcast %74 : vector<1x128xf32> to vector<32x128xf32>
    %76 = arith.cmpf oeq, %72, %75 : vector<32x128xf32>
    %cst_23 = arith.constant 0xFF800000 : f32
    %77 = vector.broadcast %cst_23 : f32 to vector<32x128xf32>
    %78 = arith.select %76, %77, %72 : vector<32x128xi1>, vector<32x128xf32>
    %cst_24 = arith.constant dense<0xFF800000> : vector<128xf32>
    %79 = vector.multi_reduction <maximumf>, %78, %cst_24 [0] : vector<32x128xf32> to vector<128xf32>
    %80 = vector.shape_cast %79 : vector<128xf32> to vector<1x128xf32>
    %81 = arith.addf %74, %80 : vector<1x128xf32>
    %82 = vector.broadcast %80 : vector<1x128xf32> to vector<32x128xf32>
    %83 = arith.cmpf oeq, %78, %82 : vector<32x128xf32>
    %cst_25 = arith.constant 0xFF800000 : f32
    %84 = vector.broadcast %cst_25 : f32 to vector<32x128xf32>
    %85 = arith.select %83, %84, %78 : vector<32x128xi1>, vector<32x128xf32>
    %cst_26 = arith.constant dense<0xFF800000> : vector<128xf32>
    %86 = vector.multi_reduction <maximumf>, %85, %cst_26 [0] : vector<32x128xf32> to vector<128xf32>
    %87 = vector.shape_cast %86 : vector<128xf32> to vector<1x128xf32>
    %88 = arith.addf %81, %87 : vector<1x128xf32>
    %89 = tpu.concatenate %37, %54, %71, %88 in 0 : vector<1x128xf32>, vector<1x128xf32>, vector<1x128xf32>, vector<1x128xf32> -> vector<4x128xf32>
    %cst_27 = arith.constant dense<0.000000e+00> : vector<8x4xf32>
    %90 = tpu.matmul %11, %89, %cst_27 {dimension_numbers = #tpu.dot_dimension_numbers<[1], [1], [0], [0], [0, 0, 1, 0], [], []>} : vector<8x128xf32>, vector<4x128xf32>, vector<8x4xf32> -> vector<8x4xf32>
    %91 = arith.index_cast %13 : i32 to index
    %c0_28 = arith.constant 0 : index
    %c0_29 = arith.constant 0 : index
    %92 = vector.load %arg3[%91, %c0_28, %c0_29] : memref<1x8x4xf32, #tpu.memory_space<vmem>>, vector<1x8x4xf32>
    %93 = vector.shape_cast %92 : vector<1x8x4xf32> to vector<8x4xf32>
    %94 = vector.shape_cast %90 : vector<8x4xf32> to vector<1x8x4xf32>
    tpu.vector_store %arg3[%91, %c0_28, %c0_29], %94 {strides = array<i32>} : memref<1x8x4xf32, #tpu.memory_space<vmem>>, vector<1x8x4xf32>,
    %c1_i32_30 = arith.constant 1 : i32
    return
  }
  func.func @transform_0(%arg0: i32) -> (i32, i32, i32) {
    %c0_i32 = arith.constant 0 : i32
    %c0_i32_0 = arith.constant 0 : i32
    %c0_i32_1 = arith.constant 0 : i32
    return %arg0, %c0_i32, %c0_i32_0 : i32, i32, i32
  }
  func.func @transform_1(%arg0: i32) -> (i32, i32, i32) {
    %c0_i32 = arith.constant 0 : i32
    %c0_i32_0 = arith.constant 0 : i32
    %c0_i32_1 = arith.constant 0 : i32
    return %arg0, %c0_i32, %c0_i32_0 : i32, i32, i32
  }
  func.func @transform_2(%arg0: i32) -> (i32, i32, i32) {
    %c0_i32 = arith.constant 0 : i32
    %c0_i32_0 = arith.constant 0 : i32
    %c0_i32_1 = arith.constant 0 : i32
    return %arg0, %c0_i32, %c0_i32_0 : i32, i32, i32
  }
}

</mosaic_0001>

<bundles_post_ra>
// kernel: tpu_custom_call.1
= control target key start
LH: loop header
LB: loop body
LE: loop exit
PB: predicated region body
PF: predicated region fallthrough
CT: control target
= control target key end

     0   :  { %s933_s9 = smov 0   ;;  %s1101_s0 = inlined_call_operand.vmem [shape: bf16[2,128,64], index: 0, kind: input, shape index: {}]   ;;  %s1102_s1 = inlined_call_operand.vmem [shape: bf16[2,128,64], index: 1, kind: input, shape index: {}]   ;;  %s1103_s2 = inlined_call_operand.vmem [shape: f32[2,8,4], index: 2, kind: output, shape index: {}]  }
   0x1 LB: > { %s754_s10 = sadd.s32 4294967295, %s913_s9   ;;  %p758_p0 = scmp.ge.s32.totalorder %s913_s9, 1  ;;  %s913_s9 = sphi %s933_s9, %s12_s9  }
   0x2   : > { %p122_p1 = scmp.lt.s32.totalorder %s913_s9, 3 }
   0x4   : > { %p123_p2 = pnand %p758_p0, %p122_p1 }
   0x5   : > { %p148_p3 = scmp.lt.s32.totalorder (!%p123_p2), %s754_s10, 1 }
   0x6   : > { %126 = sbr.rel (%p123_p2) target bundleno = 558 (0x22e), region = 28 }
   0xb   : > { %s1105_s10 = smov (!%p148_p3, %s754_s10), 1  ;;  %vm285_vm0 = vcmask 523264   ;;  %v915_v24 = vmov 0.0   ;;  %vm916_vm1 = vmmov 0  }
   0xc   : > { %s791_s11 = sshll.u32 %s1105_s10, 6  ;;  %s763_s18 = sshll.u32 %s1105_s10, 3 }
   0xd   : > { %s947_s14 = scalar_lea.vmem %s1101_s0, %s791_s11  ;;  %s959_s17 = scalar_lea.vmem %s1102_s1, %s791_s11 }
   0xe   : > { %v891_v0 = vld [vmem:[%s947_s14 + $0x38] sm:$0xff]   ;;  %v892_v1 = vld [vmem:[%s947_s14 + $0x30] sm:$0xff]   ;;  %v893_v3 = vld [vmem:[%s947_s14 + $0x28] sm:$0xff]   ;;  %s161_s21 = scalar_lea.vmem %s1103_s2, %s763_s18 }
   0xf   : > { %864 = vmatprep.subr.msk.bf16.mxu0 %vm285_vm0, %v891_v0  ;;  %865 = vmatprep.subr.msk.bf16.mxu1 %vm285_vm0, %v891_v0  ;;  %v332_v2 = vsel %vm285_vm0, %v891_v0, 0  ;;  %v329_v4 = vsel %vm285_vm0, %v892_v1, 0  ;;  %v899_v5 = vld [vmem:[%s959_s17] sm:$0xff]   ;;  %v900_v6 = vld [vmem:[%s959_s17 + $0x30] sm:$0xff]   ;;  %v326_v7 = vsel %vm285_vm0, %v893_v3, 0  ;;  %v895_v10 = vld [vmem:[%s947_s14 + $0x18] sm:$0xff]  }
  0x10   : > { %812 = vmatpush3.bf16.xpose.msra.mxu0 %v332_v2  ;;  %856 = vmatpush3.bf16.xpose.msra.mxu1 %v332_v2  ;;  %v894_v8 = vld [vmem:[%s947_s14 + $0x20] sm:$0xff]   ;;  %v320_v11 = vsel %vm285_vm0, %v895_v10, 0  ;;  %v896_v12 = vld [vmem:[%s947_s14 + $0x10] sm:$0xff]   ;;  %v897_v14 = vld [vmem:[%s947_s14 + $0x8] sm:$0xff]  }
  0x11   : > { %866 = vmatprep.subr.msk.bf16.mxu0 %vm285_vm0, %v892_v1  ;;  %867 = vmatprep.subr.msk.bf16.mxu1 %vm285_vm0, %v892_v1  ;;  %v323_v9 = vsel %vm285_vm0, %v894_v8, 0  ;;  %v317_v13 = vsel %vm285_vm0, %v896_v12, 0  ;;  %v314_v15 = vsel %vm285_vm0, %v897_v14, 0  ;;  %v898_v16 = vld [vmem:[%s947_s14] sm:$0xff]   ;;  %v901_v18 = vld [vmem:[%s959_s17 + $0x8] sm:$0xff]   ;;  %v902_v19 = vld [vmem:[%s959_s17 + $0x38] sm:$0xff]  }
  0x12   : > { %827 = vmatprep.mubr.msk.bf16.mxu0 %vm285_vm0, %v899_v5  ;;  %839 = vmatprep.mubr.msk.bf16.mxu1 %vm285_vm0, %v900_v6  ;;  %v311_v17 = vsel %vm285_vm0, %v898_v16, 0  ;;  %v903_v20 = vld [vmem:[%s959_s17 + $0x10] sm:$0xff]   ;;  %v904_v21 = vld [vmem:[%s959_s17 + $0x18] sm:$0xff]   ;;  %v905_v22 = vld [vmem:[%s959_s17 + $0x20] sm:$0xff]  }
  0x13   : > { %v906_v23 = vld [vmem:[%s959_s17 + $0x28] sm:$0xff]  }
  0x18   : > { %814 = vmatpush3.bf16.xpose.msra.mxu0 %v329_v4  ;;  %857 = vmatpush3.bf16.xpose.msra.mxu1 %v329_v4 }
  0x19   : > { %868 = vmatprep.subr.msk.bf16.mxu0 %vm285_vm0, %v893_v3  ;;  %869 = vmatprep.subr.msk.bf16.mxu1 %vm285_vm0, %v893_v3 }
  0x20   : > { %816 = vmatpush3.bf16.xpose.msra.mxu0 %v326_v7  ;;  %858 = vmatpush3.bf16.xpose.msra.mxu1 %v326_v7 }
  0x21   : > { %870 = vmatprep.subr.msk.bf16.mxu0 %vm285_vm0, %v894_v8  ;;  %871 = vmatprep.subr.msk.bf16.mxu1 %vm285_vm0, %v894_v8 }
  0x28   : > { %818 = vmatpush3.bf16.xpose.msra.mxu0 %v323_v9  ;;  %859 = vmatpush3.bf16.xpose.msra.mxu1 %v323_v9 }
  0x29   : > { %872 = vmatprep.subr.msk.bf16.mxu0 %vm285_vm0, %v895_v10  ;;  %873 = vmatprep.subr.msk.bf16.mxu1 %vm285_vm0, %v895_v10 }
  0x30   : > { %820 = vmatpush3.bf16.xpose.msra.mxu0 %v320_v11  ;;  %860 = vmatpush3.bf16.xpose.msra.mxu1 %v320_v11 }
  0x31   : > { %874 = vmatprep.subr.msk.bf16.mxu0 %vm285_vm0, %v896_v12  ;;  %875 = vmatprep.subr.msk.bf16.mxu1 %vm285_vm0, %v896_v12 }
  0x38   : > { %822 = vmatpush3.bf16.xpose.msra.mxu0 %v317_v13  ;;  %861 = vmatpush3.bf16.xpose.msra.mxu1 %v317_v13 }
  0x39   : > { %876 = vmatprep.subr.msk.bf16.mxu0 %vm285_vm0, %v897_v14  ;;  %877 = vmatprep.subr.msk.bf16.mxu1 %vm285_vm0, %v897_v14 }
  0x40   : > { %824 = vmatpush3.bf16.xpose.msra.mxu0 %v314_v15  ;;  %862 = vmatpush3.bf16.xpose.msra.mxu1 %v314_v15 }
  0x41   : > { %878 = vmatprep.subr.msk.bf16.mxu0 %vm285_vm0, %v898_v16  ;;  %879 = vmatprep.subr.msk.bf16.mxu1 %vm285_vm0, %v898_v16 }
  0x48   : > { %826 = vmatpush3.bf16.xpose.msra.mxu0 %v311_v17  ;;  %863 = vmatpush3.bf16.xpose.msra.mxu1 %v311_v17 }
  0x49   : > { %843 = vmatprep.subr.mxu1 %v915_v24 }
  0x4f   : > { %828 = vmatmul.mubr.msk.bf16.vlgmr.msra.gmra.mxu0 %vm285_vm0, %v901_v18  ;;  %840 = vmatmul.mubr.msk.bf16.vlgmr.msra.gmra.mxu1 %vm285_vm0, %v902_v19 }
  0x50   : > { %831 = vmatprep.mubr.msk.bf16.mxu0 %vm285_vm0, %v903_v20  ;;  %845 = vmatprep.mubr.msk.f32.mxu1 %vm916_vm1, %v915_v24 }
  0x57   : > { %832 = vmatmul.mubr.msk.bf16.gmra.mxu0 %vm285_vm0, %v904_v21 }
  0x58   : > { %835 = vmatprep.mubr.msk.bf16.mxu0 %vm285_vm0, %v905_v22 }
  0x5f   : > { %836 = vmatmul.mubr.msk.bf16.gmra.mxu0 %vm285_vm0, %v906_v23 }
 0x10f   : > { %v829_v25 = vpop.f32.mrf.mxu0  ;;  %v841_v26 = vpop.f32.mrf.mxu1 }
 0x111   : > { %v368_v27 = vpop.f32.mrf.mxu0  ;;  %v416_v28 = vpop.f32.mrf.mxu1 }
 0x113   : > { %v830_v29 = vpop.f32.mrf.mxu0  ;;  %v842_v30 = vpop.f32.mrf.mxu1 }
 0x114   : > { %v567_v31 = vmax.f32 %v841_v26, %v842_v30  ;;  %v432_v34 = vmax.f32 %v829_v25, %v830_v29 }
 0x115   : > { %v371_v32 = vpop.f32.mrf.mxu0  ;;  %v419_v33 = vpop.f32.mrf.mxu1 }
 0x116   : > { %v431_v35 = vmax.f32 %v368_v27, %v371_v32  ;;  %v566_v36 = vmax.f32 %v416_v28, %v419_v33 }
 0x117   : > { %v1002_v37 = vpop.f32.mrf.mxu0 }
 0x118   : > { %v433_v38 = vmax.f32 %v431_v35, %v432_v34  ;;  %v568_v39 = vmax.f32 %v566_v36, %v567_v31 }
 0x119   : > { %v1004_v40 = vpop.f32.mrf.mxu0 }
 0x11a   : > { %v434_v41 = vrot.slane %v433_v38, 4  ;;  %v569_v42 = vrot.slane %v568_v39, 4 }
 0x11b   : > { %v1006_v43 = vpop.f32.mrf.mxu0 }
 0x11c   : > { %v435_v44 = vmax.f32 %v433_v38, %v434_v41  ;;  %v570_v45 = vmax.f32 %v568_v39, %v569_v42  ;;  %v477_v49 = vmax.f32 %v1002_v37, %v1006_v43 }
 0x11d   : > { %v387_v46 = vpop.f32.mrf.mxu0 }
 0x11e   : > { %v436_v47 = vrot.slane %v435_v44, 2  ;;  %v571_v48 = vrot.slane %v570_v45, 2  ;;  %v476_v50 = vmax.f32 %v1004_v40, %v387_v46 }
 0x11f   : > { %v1011_v51 = vpop.f32.mrf.mxu0 }
 0x120   : > { %v437_v52 = vmax.f32 %v435_v44, %v436_v47  ;;  %v572_v53 = vmax.f32 %v570_v45, %v571_v48  ;;  %v478_v54 = vmax.f32 %v476_v50, %v477_v49 }
 0x121   : > { %v1013_v55 = vpop.f32.mrf.mxu0 }
 0x122   : > { %v438_v56 = vrot.slane %v437_v52, 1  ;;  %v573_v57 = vrot.slane %v572_v53, 1  ;;  %v479_v58 = vrot.slane %v478_v54, 4 }
 0x123   : > { %v1019_v61 = vpop.f32.mrf.mxu0 }
 0x124   : > { %v1015_v59 = vmax.f32 %v437_v52, %v438_v56  ;;  %v1017_v60 = vmax.f32 %v572_v53, %v573_v57  ;;  %v480_v62 = vmax.f32 %v478_v54, %v479_v58  ;;  %v522_v14 = vmax.f32 %v1011_v51, %v1019_v61 }
 0x125   : > { %v1030_v5 = vpop.f32.mrf.mxu0 }
 0x126   : > { %vm440_vm2 = vcmp.eq.f32.partialorder %v368_v27, %v1015_v59  ;;  %vm441_vm3 = vcmp.eq.f32.partialorder %v371_v32, %v1015_v59  ;;  %vm442_vm4 = vcmp.eq.f32.partialorder %v829_v25, %v1015_v59  ;;  %vm443_vm5 = vcmp.eq.f32.partialorder %v830_v29, %v1015_v59 }
 0x127   : > { %v444_v63 = vsel %vm440_vm2, -inf, %v368_v27  ;;  %v445_v0 = vsel %vm441_vm3, -inf, %v371_v32  ;;  %v446_v1 = vsel %vm442_vm4, -inf, %v829_v25  ;;  %v1025_v2 = vsel %vm443_vm5, -inf, %v830_v29 }
 0x128   : > { %v448_v3 = vmax.f32 %v444_v63, %v445_v0  ;;  %v449_v4 = vmax.f32 %v446_v1, %v1025_v2  ;;  %vm575_vm6 = vcmp.eq.f32.partialorder %v416_v28, %v1017_v60  ;;  %vm576_vm7 = vcmp.eq.f32.partialorder %v419_v33, %v1017_v60 }
 0x129   : > { %vm577_vm8 = vcmp.eq.f32.partialorder %v841_v26, %v1017_v60  ;;  %vm578_vm9 = vcmp.eq.f32.partialorder %v842_v30, %v1017_v60  ;;  %v579_v6 = vsel %vm575_vm6, -inf, %v416_v28  ;;  %v580_v7 = vsel %vm576_vm7, -inf, %v419_v33 }
 0x12a   : > { %v450_v8 = vmax.f32 %v448_v3, %v449_v4  ;;  %v1034_v9 = vsel %vm577_vm8, -inf, %v841_v26  ;;  %v1036_v10 = vsel %vm578_vm9, -inf, %v842_v30  ;;  %v583_v11 = vmax.f32 %v579_v6, %v580_v7 }
 0x12b   : > { %v584_v12 = vmax.f32 %v1034_v9, %v1036_v10  ;;  %v481_v13 = vrot.slane %v480_v62, 2  ;;  %v521_v15 = vmax.f32 %v1013_v55, %v1030_v5 }
 0x12c   : > { %v451_v16 = vrot.slane %v450_v8, 4 }
 0x12d   : > { %v585_v17 = vmax.f32 %v583_v11, %v584_v12  ;;  %v482_v18 = vmax.f32 %v480_v62, %v481_v13  ;;  %v523_v19 = vmax.f32 %v521_v15, %v522_v14 }
 0x12e   : > { %v452_v20 = vmax.f32 %v450_v8, %v451_v16 }
 0x12f   : > { %v586_v21 = vrot.slane %v585_v17, 4  ;;  %v483_v22 = vrot.slane %v482_v18, 1  ;;  %v524_v23 = vrot.slane %v523_v19, 4 }
 0x130   : > { %v453_v24 = vrot.slane %v452_v20, 2 }
 0x131   : > { %v587_v25 = vmax.f32 %v585_v17, %v586_v21  ;;  %v1044_v26 = vmax.f32 %v482_v18, %v483_v22  ;;  %v525_v28 = vmax.f32 %v523_v19, %v524_v23 }
 0x132   : > { %v454_v27 = vmax.f32 %v452_v20, %v453_v24 }
 0x133   : > { %v588_v29 = vrot.slane %v587_v25, 2  ;;  %vm485_vm10 = vcmp.eq.f32.partialorder %v1004_v40, %v1044_v26  ;;  %vm486_vm11 = vcmp.eq.f32.partialorder %v387_v46, %v1044_v26  ;;  %vm487_vm12 = vcmp.eq.f32.partialorder %v1002_v37, %v1044_v26 }
 0x134   : > { %vm488_vm13 = vcmp.eq.f32.partialorder %v1006_v43, %v1044_v26  ;;  %v489_v30 = vsel %vm485_vm10, -inf, %v1004_v40  ;;  %v490_v31 = vsel %vm486_vm11, -inf, %v387_v46  ;;  %v455_v32 = vrot.slane %v454_v27, 1 }
 0x135   : > { %v589_v33 = vmax.f32 %v587_v25, %v588_v29  ;;  %v491_v34 = vsel %vm487_vm12, -inf, %v1002_v37  ;;  %v492_v35 = vsel %vm488_vm13, -inf, %v1006_v43  ;;  %v493_v36 = vmax.f32 %v489_v30, %v490_v31 }
 0x136   : > { %v494_v38 = vmax.f32 %v491_v34, %v492_v35  ;;  %v526_v39 = vrot.slane %v525_v28, 2  ;;  %v1056_v42 = vmax.f32 %v454_v27, %v455_v32 }
 0x137   : > { %v590_v41 = vrot.slane %v589_v33, 1 }
 0x138   : > { %v495_v44 = vmax.f32 %v493_v36, %v494_v38  ;;  %v527_v45 = vmax.f32 %v525_v28, %v526_v39  ;;  %vm458_vm14 = vcmp.eq.f32.partialorder %v444_v63, %v1056_v42  ;;  %vm459_vm15 = vcmp.eq.f32.partialorder %v445_v0, %v1056_v42 }
 0x139   : > { %v1058_v47 = vmax.f32 %v589_v33, %v590_v41  ;;  %vm460_vm0 = vcmp.eq.f32.partialorder %v446_v1, %v1056_v42  ;;  %vm461_vm1 = vcmp.eq.f32.partialorder %v1025_v2, %v1056_v42  ;;  %v462_v43 = vsel %vm458_vm14, -inf, %v444_v63 }
 0x13a   : > { %v496_v40 = vrot.slane %v495_v44, 4  ;;  %v528_v37 = vrot.slane %v527_v45, 1  ;;  %v463_v48 = vsel %vm459_vm15, -inf, %v445_v0  ;;  %v464_v49 = vsel %vm460_vm0, -inf, %v446_v1 }
 0x13b   : > { %vm593_vm2 = vcmp.eq.f32.partialorder %v579_v6, %v1058_v47  ;;  %vm594_vm3 = vcmp.eq.f32.partialorder %v580_v7, %v1058_v47  ;;  %v465_v52 = vsel %vm461_vm1, -inf, %v1025_v2  ;;  %vm595_vm4 = vcmp.eq.f32.partialorder %v1034_v9, %v1058_v47 }
 0x13c   : > { %v497_v46 = vmax.f32 %v495_v44, %v496_v40  ;;  %v1067_v50 = vmax.f32 %v527_v45, %v528_v37  ;;  %vm596_vm5 = vcmp.eq.f32.partialorder %v1036_v10, %v1058_v47  ;;  %v597_v54 = vsel %vm593_vm2, -inf, %v579_v6 }
 0x13d   : > { %v598_v56 = vsel %vm594_vm3, -inf, %v580_v7  ;;  %v599_v62 = vsel %vm595_vm4, -inf, %v1034_v9  ;;  %v600_v2 = vsel %vm596_vm5, -inf, %v1036_v10  ;;  %v466_v11 = vmax.f32 %v462_v43, %v463_v48 }
 0x13e   : > { %v498_v53 = vrot.slane %v497_v46, 2  ;;  %vm530_vm6 = vcmp.eq.f32.partialorder %v1013_v55, %v1067_v50  ;;  %vm531_vm7 = vcmp.eq.f32.partialorder %v1030_v5, %v1067_v50  ;;  %vm532_vm8 = vcmp.eq.f32.partialorder %v1011_v51, %v1067_v50 }
 0x13f   : > { %vm533_vm9 = vcmp.eq.f32.partialorder %v1019_v61, %v1067_v50  ;;  %v534_v58 = vsel %vm530_vm6, -inf, %v1013_v55  ;;  %v535_v63 = vsel %vm531_vm7, -inf, %v1030_v5  ;;  %v536_v0 = vsel %vm532_vm8, -inf, %v1011_v51 }
 0x140   : > { %v499_v57 = vmax.f32 %v497_v46, %v498_v53  ;;  %v537_v1 = vsel %vm533_vm9, -inf, %v1019_v61  ;;  %v538_v4 = vmax.f32 %v534_v58, %v535_v63  ;;  %v467_v12 = vmax.f32 %v464_v49, %v465_v52 }
 0x141   : > { %v539_v6 = vmax.f32 %v536_v0, %v537_v1  ;;  %v601_v13 = vmax.f32 %v597_v54, %v598_v56  ;;  %v602_v14 = vmax.f32 %v599_v62, %v600_v2  ;;  %v163_v45 = vlaneseq }
 0x142   : > { %v500_v3 = vrot.slane %v499_v57, 1  ;;  %v468_v16 = vmax.f32 %v466_v11, %v467_v12  ;;  %vm611_vm2 = vcmask 1040384   ;;  %vm613_vm3 = vcmask 1041408  }
 0x143   : > { %v540_v8 = vmax.f32 %v538_v4, %v539_v6  ;;  %v603_v19 = vmax.f32 %v601_v13, %v602_v14  ;;  %v166_v49 = vshrl.u32 %v163_v45, 7  ;;  %v164_v2 = vand.u32 127, %v163_v45 }
 0x144   : > { %v501_v7 = vmax.f32 %v499_v57, %v500_v3  ;;  %v469_v22 = vrot.slane %v468_v16, 4  ;;  %v457_v3 = vadd.f32 %v1056_v42, %v1015_v59  ;;  %v592_v14 = vadd.f32 %v1058_v47, %v1017_v60 }
 0x145   : > { %v541_v10 = vrot.slane %v540_v8, 4  ;;  %v604_v24 = vrot.slane %v603_v19, 4  ;;  %vm615_vm4 = vcmask 1042432   ;;  %vm687_vm8 = vcmask 31744  }
 0x146   : > { %vm503_vm10 = vcmp.eq.f32.partialorder %v489_v30, %v501_v7  ;;  %vm504_vm11 = vcmp.eq.f32.partialorder %v490_v31, %v501_v7  ;;  %vm505_vm12 = vcmp.eq.f32.partialorder %v491_v34, %v501_v7  ;;  %vm506_vm13 = vcmp.eq.f32.partialorder %v492_v35, %v501_v7 }
 0x147   : > { %v507_v55 = vsel %vm503_vm10, -inf, %v489_v30  ;;  %v508_v5 = vsel %vm504_vm11, -inf, %v490_v31  ;;  %v509_v51 = vsel %vm505_vm12, -inf, %v491_v34  ;;  %v510_v9 = vsel %vm506_vm13, -inf, %v492_v35 }
 0x148   : > { %v511_v61 = vmax.f32 %v507_v55, %v508_v5  ;;  %v512_v15 = vmax.f32 %v509_v51, %v510_v9  ;;  %v542_v18 = vmax.f32 %v540_v8, %v541_v10  ;;  %v470_v28 = vmax.f32 %v468_v16, %v469_v22 }
 0x149   : > { %v605_v30 = vmax.f32 %v603_v19, %v604_v24  ;;  %v917_v5 = vmov 0.020833334  }
 0x14a   : > { %v513_v17 = vmax.f32 %v511_v61, %v512_v15  ;;  %v543_v21 = vrot.slane %v542_v18, 2  ;;  %v471_v35 = vrot.slane %v470_v28, 2 }
 0x14b   : > { %v606_v41 = vrot.slane %v605_v30, 2 }
 0x14c   : > { %v514_v20 = vrot.slane %v513_v17, 4  ;;  %v544_v23 = vmax.f32 %v542_v18, %v543_v21  ;;  %v472_v37 = vmax.f32 %v470_v28, %v471_v35 }
 0x14d   : > { %v607_v48 = vmax.f32 %v605_v30, %v606_v41 }
 0x14e   : > { %v515_v25 = vmax.f32 %v513_v17, %v514_v20  ;;  %v545_v27 = vrot.slane %v544_v23, 1  ;;  %v473_v53 = vrot.slane %v472_v37, 1 }
 0x14f   : > { %v608_v57 = vrot.slane %v607_v48, 1 }
 0x150   : > { %v546_v29 = vmax.f32 %v544_v23, %v545_v27  ;;  %v516_v31 = vrot.slane %v515_v25, 2 }
 0x151   : > { %v609_v6 = vmax.f32 %v607_v48, %v608_v57 }
 0x152   : > { %vm548_vm14 = vcmp.eq.f32.partialorder %v534_v58, %v546_v29  ;;  %vm549_vm15 = vcmp.eq.f32.partialorder %v535_v63, %v546_v29  ;;  %vm550_vm0 = vcmp.eq.f32.partialorder %v536_v0, %v546_v29  ;;  %vm551_vm1 = vcmp.eq.f32.partialorder %v537_v1, %v546_v29 }
 0x153   : > { %v552_v32 = vsel %vm548_vm14, -inf, %v534_v58  ;;  %v553_v33 = vsel %vm549_vm15, -inf, %v535_v63  ;;  %v554_v34 = vsel %vm550_vm0, -inf, %v536_v0  ;;  %v555_v36 = vsel %vm551_vm1, -inf, %v537_v1 }
 0x154   : > { %v556_v38 = vmax.f32 %v552_v32, %v553_v33  ;;  %v557_v39 = vmax.f32 %v554_v34, %v555_v36  ;;  %v517_v44 = vmax.f32 %v515_v25, %v516_v31  ;;  %v167_v58 = vmul.u32 16, %v166_v49 }
 0x155   : > { %v474_v63 = vmax.f32 %v472_v37, %v473_v53  ;;  %v502_v0 = vadd.f32 %v501_v7, %v1044_v26  ;;  %v547_v11 = vadd.f32 %v546_v29, %v1067_v50  ;;  %v610_v26 = vadd.f32 %v609_v6, %v592_v14 }
 0x156   : > { %v558_v40 = vmax.f32 %v556_v38, %v557_v39  ;;  %v518_v46 = vrot.slane %v517_v44, 1  ;;  %v169_v8 = vadd.s32 16, %v167_v58  ;;  %vm168_vm5 = vcmp.ge.s32.totalorder %v164_v2, %v167_v58 }
 0x157   : > { %v475_v13 = vadd.f32 %v474_v63, %v457_v3 }
 0x158   : > { %v559_v43 = vrot.slane %v558_v40, 4  ;;  %v519_v56 = vmax.f32 %v517_v44, %v518_v46  ;;  %vm170_vm6 = vcmp.lt.s32.totalorder %v164_v2, %v169_v8 }
 0x159   : > { %vm171_vm7 = vmand %vm168_vm5, %vm170_vm6 }
 0x15a   : > { %v560_v52 = vmax.f32 %v558_v40, %v559_v43  ;;  %v520_v4 = vadd.f32 %v519_v56, %v502_v0 }
 0x15c   : > { %v561_v54 = vrot.slane %v560_v52, 2  ;;  %v612_v7 = vsel %vm611_vm2, %v475_v13, %v520_v4 }
 0x15e   : > { %v562_v62 = vmax.f32 %v560_v52, %v561_v54 }
 0x160   : > { %v563_v1 = vrot.slane %v562_v62, 1 }
 0x162   : > { %v564_v12 = vmax.f32 %v562_v62, %v563_v1 }
 0x164   : > { %v565_v55 = vadd.f32 %v564_v12, %v547_v11 }
 0x166   : > { %v614_v59 = vsel %vm613_vm3, %v612_v7, %v565_v55 }
 0x167   : > { %v616_v42 = vsel %vm615_vm4, %v614_v59, %v610_v26 }
 0x168   : > { %844 = vmatpush3.xpose.msra.mxu1 %v616_v42 }
 0x16b   : > { %846 = vmatmul.mubr.msk.f32.vlgmr.msra.gmra.mxu1 %vm171_vm7, %v917_v5 }
 0x22b   : > { %v683_v60 = vpop.f32.mrf.mxu1 }
 0x22c   : > { %688 = vst.msk [vmem:[%s161_s21] sm:$0xff] %vm687_vm8, %v683_v60 }
 0x22d   : > { %v847_v47 = vpop.f32.mrf.mxu1 }
 0x22e PF: > { %s12_s9 = sadd.s32 1, %s913_s9  }
 0x22f   : > { %p9_p4 = scmp.ge.s32.totalorder %s12_s9, 4  }
 0x231   :  { %11 = sbr.rel (!%p9_p4) target bundleno = 1 (0x1), region = 61 }

</bundles_post_ra>
